<compile_context>
chip_gen: v5e
topology: v5e:2x2
jax: 0.10.0
libtpu: 0.0.40
codegen_flags: <defaults>
</compile_context>

<pallas_src>
import functools

import jax
import jax.numpy as jnp
from jax import lax
from jax.experimental import pallas as pl
from jax.experimental.pallas import tpu as pltpu

_EPS = 1e-12                              # torch.nn.functional.normalize eps
_TARGET_TILE_BYTES = 8 * 1024 * 1024      # ~8 MiB per x block
_VMEM_LIMIT_BYTES = 32 * 1024 * 1024      # within scoped VMEM on v5e/v6e/v7x
_LANE = 128
_SUBLANE = 8


def _cdiv(a, b):
    return -(-a // b)


def _round_up(a, b):
    return _cdiv(a, b) * b


def _plan(n_total, d, itemsize, block_lanes=None, split=None):
    """Pick (core_split, tiles_per_split, tile_n) for the lane-tiled grid."""
    if block_lanes is None:
        cap = _TARGET_TILE_BYTES // max(1, d * itemsize)
        cap = max(_LANE, (cap // _LANE) * _LANE)
    else:
        cap = max(_LANE, (int(block_lanes) // _LANE) * _LANE)
    if split is None:
        # Split the row range across two partial accumulators only when there
        # is enough work for >= 2 tiles per split: ~2x on v7x's two
        # TensorCores, and only one extra (tiny) grid step on v5e/v6e.
        split = 2 if _cdiv(_round_up(max(n_total, 1), _LANE), cap) >= 4 else 1
    split = max(1, int(split))
    per_split = _cdiv(max(n_total, 1), split)
    tile_n = min(cap, _round_up(per_split, _LANE))
    tiles_per_split = _cdiv(per_split, tile_n)
    return split, tiles_per_split, tile_n


def _fused_hinge_kernel(a_ref, x_ref, out_ref, *, margin, b1, b2, b3, n_total,
                        tile_n, tiles_per_split):
    """Accumulate the four per-term hinge sums over lane tiles of x^T.

    a_ref  : (D, 1)       L2-normalized anchor (float32), held across the grid
    x_ref  : (D, tile_n)  lane tile of the transposed, concatenated embeddings
    out_ref: (1, 8, 128)  per-split partial sums; lanes 0..3 hold terms 0..3
    """
    s = pl.program_id(0)          # core-split index ("parallel")
    t = pl.program_id(1)          # lane-tile index within the split

    @pl.when(t == 0)
    def _():
        out_ref[...] = jnp.zeros_like(out_ref)

    x = x_ref[...].astype(jnp.float32)        # (D, tile_n), rows = features
    a = a_ref[...]                            # (D, 1), broadcasts over lanes

    # Folded normalization: cos_i = <x_i, a_n> * rsqrt(max(|x_i|^2, eps^2)),
    # which matches torch.nn.functional.normalize's eps semantics exactly.
    dot = jnp.sum(x * a, axis=0, keepdims=True)          # (1, tile_n)
    ss = jnp.sum(x * x, axis=0, keepdims=True)           # (1, tile_n)
    inv_norm = lax.rsqrt(jnp.maximum(ss, jnp.float32(_EPS * _EPS)))
    cos = dot * inv_norm

    # Global (concatenated) row index of every lane in this tile.
    base = (s * tiles_per_split + t) * tile_n
    col = lax.broadcasted_iota(jnp.int32, (1, tile_n), 1) + base
    ge1 = col >= b1
    ge2 = col >= b2
    ge3 = col >= b3
    valid = col < n_total

    # torch semantics:
    #   push_loss (terms 0, 2: positives)  ->  relu(margin - cos)
    #   pull_loss (terms 1, 3: negatives)  ->  relu(cos - margin)
    use_pull_loss = (ge1 & jnp.logical_not(ge2)) | ge3
    hinge = jnp.maximum(
        jnp.where(use_pull_loss, cos - margin, margin - cos), 0.0)

    # Per-term masked sums.  Masks also exclude the zero-padded tail; `where`
    # selects, so garbage/NaN in masked lanes never propagates or leaks
    # between terms.
    s0 = jnp.sum(jnp.where(jnp.logical_not(ge1) & valid, hinge, 0.0))
    s1 = jnp.sum(jnp.where(ge1 & jnp.logical_not(ge2), hinge, 0.0))
    s2 = jnp.sum(jnp.where(ge2 & jnp.logical_not(ge3), hinge, 0.0))
    s3 = jnp.sum(jnp.where(ge3 & valid, hinge, 0.0))

    lane = lax.broadcasted_iota(jnp.int32, (1, _SUBLANE, _LANE), 2)
    partial = (jnp.where(lane == 0, s0, 0.0) + jnp.where(lane == 1, s1, 0.0) +
               jnp.where(lane == 2, s2, 0.0) + jnp.where(lane == 3, s3, 0.0))
    out_ref[...] += partial


def humanml3d_loss(pos_same_emb, neg_same_emb, pos_other_emb, neg_other_emb,
                   margin=0.2, alpha1=1.0, alpha2=1.0, alpha3=1.0, alpha4=1.0,
                   block_lanes=None, split=None):
    """Pallas implementation of HumanML3DLoss.forward.

    Returns (total_loss, (L1, L2, L3, L4)) as float32 scalars.
    `block_lanes` / `split` are test/tuning overrides for the tile plan.
    """
    margin = float(margin)
    d = pos_same_emb.shape[1]

    embs = (pos_same_emb, neg_same_emb, pos_other_emb, neg_other_emb)
    counts = tuple(int(e.shape[0]) for e in embs)
    n1, n2, n3, n4 = counts
    n_total = n1 + n2 + n3 + n4
    zero = jnp.float32(0.0)
    if n_total == 0:
        return zero, (zero, zero, zero, zero)

    # Anchor and its L2 normalization: tiny (D,) work, done in the wrapper.
    # NOTE: empty pos_same -> NaN anchor (torch mean over an empty dim); L1
    # early-outs to 0.0 but the NaN propagates through L2-L4, as in torch.
    if n1 == 0:
        anchor = jnp.full((d,), jnp.nan, dtype=jnp.float32)
    else:
        anchor = jnp.mean(pos_same_emb.astype(jnp.float32), axis=0)
    a_norm = jnp.sqrt(jnp.sum(anchor * anchor))
    a_n = (anchor / jnp.maximum(a_norm, _EPS)).reshape(d, 1)

    # One fused, lane-dense input: concatenate the four sets, transpose to
    # (D, N) so rows land on the 128-wide lane axis, and zero-pad the lane
    # axis up to the grid extent (padding is fully masked in-kernel).
    # TODO(synk): optionally cast to bfloat16 here to halve HBM traffic if
    # upstream precision allows (kernel math stays f32 in-register).
    parts = [e for e in embs if e.shape[0] > 0]
    emb_all = parts[0] if len(parts) == 1 else jnp.concatenate(parts, axis=0)
    itemsize = jnp.dtype(emb_all.dtype).itemsize

    s_split, tiles_per_split, tile_n = _plan(n_total, d, itemsize,
                                             block_lanes, split)
    n_pad = s_split * tiles_per_split * tile_n
    xt = jnp.transpose(emb_all)                        # (D, N_total)
    if n_pad > n_total:
        xt = jnp.pad(xt, ((0, 0), (0, n_pad - n_total)))

    b1, b2, b3 = n1, n1 + n2, n1 + n2 + n3
    kernel = functools.partial(
        _fused_hinge_kernel, margin=margin, b1=b1, b2=b2, b3=b3,
        n_total=n_total, tile_n=tile_n, tiles_per_split=tiles_per_split)

    cost = pl.CostEstimate(
        flops=int(5 * n_pad * d + 16 * n_pad),
        transcendentals=int(n_pad),
        bytes_accessed=int(n_pad * d * itemsize + d * 4 +
                           s_split * _SUBLANE * _LANE * 4),
    )

    out = pl.pallas_call(
        kernel,
        out_shape=jax.ShapeDtypeStruct((s_split, _SUBLANE, _LANE), jnp.float32),
        grid=(s_split, tiles_per_split),
        in_specs=[
            pl.BlockSpec((d, 1), lambda s, t: (0, 0)),            # anchor, held
            pl.BlockSpec((d, tile_n),
                         lambda s, t: (0, s * tiles_per_split + t)),
        ],
        out_specs=pl.BlockSpec((1, _SUBLANE, _LANE), lambda s, t: (s, 0, 0)),
        compiler_params=pltpu.CompilerParams(
            dimension_semantics=("parallel", "arbitrary"),
            vmem_limit_bytes=_VMEM_LIMIT_BYTES),
        cost_estimate=cost,
    )(a_n, xt)

    per_term = jnp.sum(out[:, 0, :4], axis=0)          # (4,) hinge sums

    losses = []
    for t in range(4):
        if counts[t] == 0:
            losses.append(zero)     # torch returns literal 0.0 for empty input
        else:
            losses.append(per_term[t] / jnp.float32(counts[t]))
    L1, L2, L3, L4 = losses
    total = (float(alpha1) * L1 + float(alpha2) * L2 +
             float(alpha3) * L3 + float(alpha4) * L4)
    return total, (L1, L2, L3, L4)


# ---- pure-JAX reference (for validation only) -------------------------------
def _ref_loss(ps, ns, po, no, margin=0.2, a1=1.0, a2=1.0, a3=1.0, a4=1.0):
    def normalize(x):
        return x / jnp.maximum(
            jnp.sqrt(jnp.sum(x * x, axis=-1, keepdims=True)), _EPS)

    def cosine_sim(a, b):
        return normalize(a) @ normalize(b).T

    anchor = jnp.mean(ps, axis=0, keepdims=True)

    def push(emb):
        if emb.shape[0] == 0:
            return jnp.float32(0.0)
        return jnp.mean(jax.nn.relu(margin - cosine_sim(anchor, emb)))

    def pull(emb):
        if emb.shape[0] == 0:
            return jnp.float32(0.0)
        return jnp.mean(jax.nn.relu(cosine_sim(anchor, emb) - margin))

    L1, L2, L3, L4 = push(ps), pull(ns), push(po), pull(no)
    return a1 * L1 + a2 * L2 + a3 * L3 + a4 * L4, (L1, L2, L3, L4)


def _check(got_pack, want_pack):
    (gt, (g1, g2, g3, g4)) = got_pack
    (wt, (w1, w2, w3, w4)) = want_pack
    for got, want in [(gt, wt), (g1, w1), (g2, w2), (g3, w3), (g4, w4)]:
        assert jnp.allclose(got, want, atol=1e-5, rtol=1e-5), (got, want)


if __name__ == "__main__":
    key = jax.random.PRNGKey(0)
    k1, k2, k3, k4, k5, k6, k7 = jax.random.split(key, 7)

    D = 32

    # Small case: default plan, single fused block for all four terms.
    pos_same = jax.random.normal(k1, (8, D), dtype=jnp.float32)
    neg_same = jax.random.normal(k2, (6, D), dtype=jnp.float32)
    pos_other = jax.random.normal(k3, (4, D), dtype=jnp.float32)
    neg_other = jax.random.normal(k4, (10, D), dtype=jnp.float32)

    got = humanml3d_loss(pos_same, neg_same, pos_other, neg_other,
                         margin=0.2, alpha1=1.0, alpha2=1.0,
                         alpha3=1.0, alpha4=1.0)
    jax.block_until_ready(got[0])
    _check(got, _ref_loss(pos_same, neg_same, pos_other, neg_other))

    # Medium case: forces the lane grid (block_lanes=256), the 2-way split
    # (per-split partial sums), the masked zero-padded tail, and static
    # pruning of an empty term, with non-default margin/alphas.
    ps2 = jax.random.normal(k5, (1030, D), dtype=jnp.float32)
    ns2 = jax.random.normal(k6, (517, D), dtype=jnp.float32)
    po2 = jax.random.normal(k7, (640, D), dtype=jnp.float32)
    no2 = jnp.zeros((0, D), dtype=jnp.float32)

    got2 = humanml3d_loss(ps2, ns2, po2, no2,
                          margin=0.3, alpha1=0.5, alpha2=1.5,
                          alpha3=2.0, alpha4=0.25,
                          block_lanes=256, split=2)
    jax.block_until_ready(got2[0])
    _check(got2, _ref_loss(ps2, ns2, po2, no2,
                           margin=0.3, a1=0.5, a2=1.5, a3=2.0, a4=0.25))

    print("KERNEL_OK")
</pallas_src>

<mosaic_0001>
module attributes {stable_mosaic.version = 11 : i64} {
  func.func @_fused_hinge_kernel(%arg0: i32, %arg1: i32, %arg2: memref<32x1xf32, #tpu.memory_space<vmem>>, %arg3: memref<32x128xf32, #tpu.memory_space<vmem>>, %arg4: memref<1x8x128xf32, #tpu.memory_space<vmem>>) attributes {dimension_semantics = [#tpu.dimension_semantics<parallel>, #tpu.dimension_semantics<arbitrary>], iteration_bounds = array<i64: 1, 1>, scalar_prefetch = 0 : i64, scratch_operands = 0 : i64, tpu.core_type = #tpu.core_type<tc>, window_params = [{pipeline_mode = #tpu.pipeline_mode<synchronous>, transform_indices = @transform_0, window_bounds = array<i64: 32, 1>}, {transform_indices = @transform_1, window_bounds = array<i64: 32, 128>}, {transform_indices = @transform_2, window_bounds = array<i64: 1, 8, 128>}]} {
    %c0_i32 = arith.constant 0 : i32
    %0 = arith.cmpi eq, %arg1, %c0_i32 : i32
    %1 = arith.extui %0 : i1 to i32
    %c0_i32_0 = arith.constant 0 : i32
    %2 = arith.cmpi ne, %1, %c0_i32_0 : i32
    scf.if %2 {
      %cst_33 = arith.constant 0.000000e+00 : f32
      %98 = vector.broadcast %cst_33 : f32 to vector<1x8x128xf32>
      %c0_34 = arith.constant 0 : index
      %c0_35 = arith.constant 0 : index
      %c0_36 = arith.constant 0 : index
      %99 = vector.load %arg4[%c0_34, %c0_35, %c0_36] : memref<1x8x128xf32, #tpu.memory_space<vmem>>, vector<1x8x128xf32>
      tpu.vector_store %arg4[%c0_34, %c0_35, %c0_36], %98 {strides = array<i32>} : memref<1x8x128xf32, #tpu.memory_space<vmem>>, vector<1x8x128xf32>,
    } else {
    }
    %c0 = arith.constant 0 : index
    %c0_1 = arith.constant 0 : index
    %3 = vector.load %arg3[%c0, %c0_1] : memref<32x128xf32, #tpu.memory_space<vmem>>, vector<32x128xf32>
    %c0_2 = arith.constant 0 : index
    %c0_3 = arith.constant 0 : index
    %4 = vector.load %arg2[%c0_2, %c0_3] : memref<32x1xf32, #tpu.memory_space<vmem>>, vector<32x1xf32>
    %5 = vector.broadcast %4 : vector<32x1xf32> to vector<32x128xf32>
    %6 = arith.mulf %3, %5 : vector<32x128xf32>
    %cst = arith.constant dense<0.000000e+00> : vector<128xf32>
    %7 = vector.multi_reduction <add>, %6, %cst [0] : vector<32x128xf32> to vector<128xf32>
    %8 = vector.shape_cast %7 : vector<128xf32> to vector<1x128xf32>
    %9 = arith.mulf %3, %3 : vector<32x128xf32>
    %cst_4 = arith.constant dense<0.000000e+00> : vector<128xf32>
    %10 = vector.multi_reduction <add>, %9, %cst_4 [0] : vector<32x128xf32> to vector<128xf32>
    %11 = vector.shape_cast %10 : vector<128xf32> to vector<1x128xf32>
    %cst_5 = arith.constant 1.000000e-24 : f32
    %12 = vector.broadcast %cst_5 : f32 to vector<1x128xf32>
    %13 = arith.maximumf %11, %12 : vector<1x128xf32>
    %14 = math.rsqrt %13 : vector<1x128xf32>
    %15 = arith.mulf %8, %14 : vector<1x128xf32>
    %c1_i32 = arith.constant 1 : i32
    %16 = arith.muli %arg0, %c1_i32 : i32
    %17 = arith.addi %16, %arg1 : i32
    %c128_i32 = arith.constant 128 : i32
    %18 = arith.muli %17, %c128_i32 : i32
    %19 = tpu.iota {dimensions = array<i32: 1>} : vector<1x128xi32>
    %20 = vector.broadcast %18 : i32 to vector<1x128xi32>
    %21 = arith.addi %19, %20 : vector<1x128xi32>
    %c8_i32 = arith.constant 8 : i32
    %22 = vector.broadcast %c8_i32 : i32 to vector<1x128xi32>
    %23 = arith.cmpi sge, %21, %22 : vector<1x128xi32>
    %c14_i32 = arith.constant 14 : i32
    %24 = vector.broadcast %c14_i32 : i32 to vector<1x128xi32>
    %25 = arith.cmpi sge, %21, %24 : vector<1x128xi32>
    %c18_i32 = arith.constant 18 : i32
    %26 = vector.broadcast %c18_i32 : i32 to vector<1x128xi32>
    %27 = arith.cmpi sge, %21, %26 : vector<1x128xi32>
    %c28_i32 = arith.constant 28 : i32
    %28 = vector.broadcast %c28_i32 : i32 to vector<1x128xi32>
    %29 = arith.cmpi slt, %21, %28 : vector<1x128xi32>
    %cst_6 = arith.constant dense<true> : vector<1x128xi1>
    %30 = arith.xori %25, %cst_6 : vector<1x128xi1>
    %31 = arith.andi %23, %30 : vector<1x128xi1>
    %32 = arith.ori %31, %27 : vector<1x128xi1>
    %cst_7 = arith.constant 2.000000e-01 : f32
    %33 = vector.broadcast %cst_7 : f32 to vector<1x128xf32>
    %34 = arith.subf %15, %33 : vector<1x128xf32>
    %cst_8 = arith.constant 2.000000e-01 : f32
    %35 = vector.broadcast %cst_8 : f32 to vector<1x128xf32>
    %36 = arith.subf %35, %15 : vector<1x128xf32>
    %37 = arith.select %32, %34, %36 : vector<1x128xi1>, vector<1x128xf32>
    %cst_9 = arith.constant 0.000000e+00 : f32
    %38 = vector.broadcast %cst_9 : f32 to vector<1x128xf32>
    %39 = arith.maximumf %37, %38 : vector<1x128xf32>
    %cst_10 = arith.constant dense<true> : vector<1x128xi1>
    %40 = arith.xori %23, %cst_10 : vector<1x128xi1>
    %41 = arith.andi %40, %29 : vector<1x128xi1>
    %cst_11 = arith.constant 0.000000e+00 : f32
    %42 = vector.broadcast %cst_11 : f32 to vector<1x128xf32>
    %43 = arith.select %41, %39, %42 : vector<1x128xi1>, vector<1x128xf32>
    %44 = vector.shape_cast %43 : vector<1x128xf32> to vector<1x1x128xf32>
    %cst_12 = arith.constant dense<0.000000e+00> : vector<1xf32>
    %45 = vector.multi_reduction <add>, %44, %cst_12 [1, 2] : vector<1x1x128xf32> to vector<1xf32>
    %46 = vector.shape_cast %45 : vector<1xf32> to vector<1x1x1xf32>
    %47 = vector.extract %46[0, 0, 0] : f32 from vector<1x1x1xf32>
    %cst_13 = arith.constant dense<true> : vector<1x128xi1>
    %48 = arith.xori %25, %cst_13 : vector<1x128xi1>
    %49 = arith.andi %23, %48 : vector<1x128xi1>
    %cst_14 = arith.constant 0.000000e+00 : f32
    %50 = vector.broadcast %cst_14 : f32 to vector<1x128xf32>
    %51 = arith.select %49, %39, %50 : vector<1x128xi1>, vector<1x128xf32>
    %52 = vector.shape_cast %51 : vector<1x128xf32> to vector<1x1x128xf32>
    %cst_15 = arith.constant dense<0.000000e+00> : vector<1xf32>
    %53 = vector.multi_reduction <add>, %52, %cst_15 [1, 2] : vector<1x1x128xf32> to vector<1xf32>
    %54 = vector.shape_cast %53 : vector<1xf32> to vector<1x1x1xf32>
    %55 = vector.extract %54[0, 0, 0] : f32 from vector<1x1x1xf32>
    %cst_16 = arith.constant dense<true> : vector<1x128xi1>
    %56 = arith.xori %27, %cst_16 : vector<1x128xi1>
    %57 = arith.andi %25, %56 : vector<1x128xi1>
    %cst_17 = arith.constant 0.000000e+00 : f32
    %58 = vector.broadcast %cst_17 : f32 to vector<1x128xf32>
    %59 = arith.select %57, %39, %58 : vector<1x128xi1>, vector<1x128xf32>
    %60 = vector.shape_cast %59 : vector<1x128xf32> to vector<1x1x128xf32>
    %cst_18 = arith.constant dense<0.000000e+00> : vector<1xf32>
    %61 = vector.multi_reduction <add>, %60, %cst_18 [1, 2] : vector<1x1x128xf32> to vector<1xf32>
    %62 = vector.shape_cast %61 : vector<1xf32> to vector<1x1x1xf32>
    %63 = vector.extract %62[0, 0, 0] : f32 from vector<1x1x1xf32>
    %64 = arith.andi %27, %29 : vector<1x128xi1>
    %cst_19 = arith.constant 0.000000e+00 : f32
    %65 = vector.broadcast %cst_19 : f32 to vector<1x128xf32>
    %66 = arith.select %64, %39, %65 : vector<1x128xi1>, vector<1x128xf32>
    %67 = vector.shape_cast %66 : vector<1x128xf32> to vector<1x1x128xf32>
    %cst_20 = arith.constant dense<0.000000e+00> : vector<1xf32>
    %68 = vector.multi_reduction <add>, %67, %cst_20 [1, 2] : vector<1x1x128xf32> to vector<1xf32>
    %69 = vector.shape_cast %68 : vector<1xf32> to vector<1x1x1xf32>
    %70 = vector.extract %69[0, 0, 0] : f32 from vector<1x1x1xf32>
    %71 = tpu.iota {dimensions = array<i32: 2>} : vector<1x8x128xi32>
    %c0_i32_21 = arith.constant 0 : i32
    %72 = vector.broadcast %c0_i32_21 : i32 to vector<1x8x128xi32>
    %73 = arith.cmpi eq, %71, %72 : vector<1x8x128xi32>
    %cst_22 = arith.constant 0.000000e+00 : f32
    %74 = vector.broadcast %47 : f32 to vector<1x8x128xf32>
    %75 = vector.broadcast %cst_22 : f32 to vector<1x8x128xf32>
    %76 = arith.select %73, %74, %75 : vector<1x8x128xi1>, vector<1x8x128xf32>
    %c1_i32_23 = arith.constant 1 : i32
    %77 = vector.broadcast %c1_i32_23 : i32 to vector<1x8x128xi32>
    %78 = arith.cmpi eq, %71, %77 : vector<1x8x128xi32>
    %cst_24 = arith.constant 0.000000e+00 : f32
    %79 = vector.broadcast %55 : f32 to vector<1x8x128xf32>
    %80 = vector.broadcast %cst_24 : f32 to vector<1x8x128xf32>
    %81 = arith.select %78, %79, %80 : vector<1x8x128xi1>, vector<1x8x128xf32>
    %82 = arith.addf %76, %81 : vector<1x8x128xf32>
    %c2_i32 = arith.constant 2 : i32
    %83 = vector.broadcast %c2_i32 : i32 to vector<1x8x128xi32>
    %84 = arith.cmpi eq, %71, %83 : vector<1x8x128xi32>
    %cst_25 = arith.constant 0.000000e+00 : f32
    %85 = vector.broadcast %63 : f32 to vector<1x8x128xf32>
    %86 = vector.broadcast %cst_25 : f32 to vector<1x8x128xf32>
    %87 = arith.select %84, %85, %86 : vector<1x8x128xi1>, vector<1x8x128xf32>
    %88 = arith.addf %82, %87 : vector<1x8x128xf32>
    %c3_i32 = arith.constant 3 : i32
    %89 = vector.broadcast %c3_i32 : i32 to vector<1x8x128xi32>
    %90 = arith.cmpi eq, %71, %89 : vector<1x8x128xi32>
    %cst_26 = arith.constant 0.000000e+00 : f32
    %91 = vector.broadcast %70 : f32 to vector<1x8x128xf32>
    %92 = vector.broadcast %cst_26 : f32 to vector<1x8x128xf32>
    %93 = arith.select %90, %91, %92 : vector<1x8x128xi1>, vector<1x8x128xf32>
    %94 = arith.addf %88, %93 : vector<1x8x128xf32>
    %c0_27 = arith.constant 0 : index
    %c0_28 = arith.constant 0 : index
    %c0_29 = arith.constant 0 : index
    %95 = vector.load %arg4[%c0_27, %c0_28, %c0_29] : memref<1x8x128xf32, #tpu.memory_space<vmem>>, vector<1x8x128xf32>
    %96 = arith.addf %95, %94 : vector<1x8x128xf32>
    %c0_30 = arith.constant 0 : index
    %c0_31 = arith.constant 0 : index
    %c0_32 = arith.constant 0 : index
    %97 = vector.load %arg4[%c0_30, %c0_31, %c0_32] : memref<1x8x128xf32, #tpu.memory_space<vmem>>, vector<1x8x128xf32>
    tpu.vector_store %arg4[%c0_30, %c0_31, %c0_32], %96 {strides = array<i32>} : memref<1x8x128xf32, #tpu.memory_space<vmem>>, vector<1x8x128xf32>,
    return
  }
  func.func @transform_0(%arg0: i32, %arg1: i32) -> (i32, i32) {
    %c0_i32 = arith.constant 0 : i32
    %c0_i32_0 = arith.constant 0 : i32
    %c0_i32_1 = arith.constant 0 : i32
    return %c0_i32, %c0_i32_0 : i32, i32
  }
  func.func @transform_1(%arg0: i32, %arg1: i32) -> (i32, i32) {
    %c1_i32 = arith.constant 1 : i32
    %0 = arith.muli %arg0, %c1_i32 : i32
    %1 = arith.addi %0, %arg1 : i32
    %c0_i32 = arith.constant 0 : i32
    %c0_i32_0 = arith.constant 0 : i32
    return %c0_i32, %1 : i32, i32
  }
  func.func @transform_2(%arg0: i32, %arg1: i32) -> (i32, i32, i32) {
    %c0_i32 = arith.constant 0 : i32
    %c0_i32_0 = arith.constant 0 : i32
    %c0_i32_1 = arith.constant 0 : i32
    return %arg0, %c0_i32, %c0_i32_0 : i32, i32, i32
  }
}

</mosaic_0001>

<bundles_post_ra>
// kernel: tpu_custom_call.1
= control target key start
LH: loop header
LB: loop body
LE: loop exit
PB: predicated region body
PF: predicated region fallthrough
CT: control target
= control target key end

     0   :  { %v250_v2 = vmov 0   ;;  %s317_s0 = inlined_call_operand.vmem [shape: f32[32,1], index: 0, kind: input, shape index: {}]   ;;  %s318_s1 = inlined_call_operand.vmem [shape: f32[32,128], index: 1, kind: input, shape index: {}]   ;;  %s319_s2 = inlined_call_operand.hbm [shape: f32[1,8,128], index: 2, kind: output, shape index: {}]  }
   0x1   :  { %v40_v0 = vld [vmem:[%s317_s0 + $0x10] sm:$0xff]  ;;  %v38_v1 = vld [vmem:[%s317_s0] sm:$0xff]  ;;  %221 = vset.pattern.permute.xlu1 %v250_v2  ;;  %220 = vset.pattern.permute.xlu0 %v250_v2 }
   0x2   :  { %7 = vsyncpa [#allocation3], 0  ;;  %54 = vperm.xlu1 %221, %v40_v0   ;;  %44 = vperm.xlu0 %220, %v38_v1   ;;  %v41_v3 = vld [vmem:[%s317_s0 + $0x18] sm:$0xff]  ;;  %v39_v4 = vld [vmem:[%s317_s0 + $0x8] sm:$0xff]  ;;  %v102_v34 = vlaneseq  ;;  %vm251_vm4 = vmmov 1   ;;  %s252_s27 = smov [#allocation2]  }
   0x3   :  { %v34_v5 = vld [vmem:[%s318_s1] sm:$0xff]  ;;  %v35_v6 = vld [vmem:[%s318_s1 + $0x8] sm:$0xff]  ;;  %v36_v9 = vld [vmem:[%s318_s1 + $0x10] sm:$0xff]  ;;  %s190_s28 = sshll.u32 %s252_s27, 4  ;;  %s192_s3 = sshll.u32 %s319_s2, 4  ;;  %s191_s28 = int_to_ptr.vmem [resolvable:$true] %s190_s28  ;;  %s193_s3 = int_to_ptr.hbm [resolvable:$true] %s192_s3 }
   0x4   :  { %v75_v7 = vmul.f32 %v34_v5, %v34_v5  ;;  %v76_v8 = vmul.f32 %v35_v6, %v35_v6  ;;  %v77_v10 = vmul.f32 %v36_v9, %v36_v9  ;;  %v37_v12 = vld [vmem:[%s318_s1 + $0x18] sm:$0xff]  ;;  %v292_v39 = vand.u32 127, %v102_v34 }
   0x5   :  { %v78_v13 = vmul.f32 %v37_v12, %v37_v12 }
   0x6   :  { %v79_v11 = vadd.f32 %v76_v8, %v75_v7  ;;  %vm107_vm0 = vcmp.ge.s32.totalorder %v292_v39, 14  ;;  %vm106_vm3 = vcmp.ge.s32.totalorder %v292_v39, 8  ;;  %vm108_vm7 = vcmp.ge.s32.totalorder %v292_v39, 18 }
   0x7   :  { %vm110_vm5 = vmxor %vm107_vm0, %vm251_vm4  ;;  %vm109_vm9 = vcmp.lt.s32.totalorder %v292_v39, 28 }
   0x8   :  { %v80_v14 = vadd.f32 %v79_v11, %v77_v10  ;;  %vm299_vm8 = vmand %vm106_vm3, %vm110_vm5 }
   0x9   :  { %vm112_vm10 = vmor %vm299_vm8, %vm108_vm7 }
   0xa   :  { %59 = vperm.xlu1 %221, %v41_v3   ;;  %49 = vperm.xlu0 %220, %v39_v4   ;;  %v81_v15 = vadd.f32 %v80_v14, %v78_v13  ;;  %vm142_vm11 = vmxor %vm108_vm7, %vm251_vm4 }
   0xb   :  { %vm117_vm12 = vmxor %vm106_vm3, %vm251_vm4  ;;  %vm174_vm3 = vcmp.eq.s32.totalorder %v292_v39, 2  ;;  %vm178_vm4 = vcmp.eq.s32.totalorder %v292_v39, 3 }
   0xc   :  { %v82_v16 = vrot.slane %v81_v15, 4  ;;  %vm155_vm13 = vmand %vm108_vm7, %vm109_vm9 }
   0xd   :  { %vm143_vm14 = vmand %vm107_vm0, %vm142_vm11  ;;  %vm167_vm0 = vcmp.eq.s32.totalorder %v292_v39, 0 }
   0xe   :  { %v83_v17 = vadd.f32 %v82_v16, %v81_v15  ;;  %vm118_vm15 = vmand %vm117_vm12, %vm109_vm9 }
  0x10   :  { %v84_v18 = vrot.slane %v83_v17, 2 }
  0x12   :  { %v85_v19 = vadd.f32 %v84_v18, %v83_v17 }
  0x14   :  { %v86_v20 = vrot.slane %v85_v19, 1 }
  0x16   :  { %v87_v21 = vadd.f32 %v86_v20, %v85_v19 }
  0x18   :  { %v88_v22 = vmax.f32 %v87_v21, 1e-24 }
  0x1a   :  { %222 = vrsqrt.f32 %v88_v22  ;;  %vm95_vm1 = vweird.f32 %v88_v22 }
  0x20   :  { %v223_v25 = vpop.eup %222 }
  0x21   :  { %v90_v26 = vmul.f32 %v223_v25, %v88_v22  ;;  %vm96_vm2 = vweird.f32 %v223_v25 }
  0x22   :  { %vm97_vm6 = vmor %vm95_vm1, %vm96_vm2  ;;  %vm120_vm1 = vcmask 1040384   ;;  %vm170_vm2 = vcmp.eq.s32.totalorder %v292_v39, 1 }
  0x23   :  { %v91_v31 = vmul.f32 %v223_v25, %v90_v26 }
  0x25   :  { %v92_v37 = vmul.f32 0.5, %v91_v31 }
  0x27   :  { %v93_v41 = vsub.f32 1.5, %v92_v37 }
  0x29   :  { %v94_v44 = vmul.f32 %v223_v25, %v93_v41 }
  0x2b   :  { %v98_v48 = vsel %vm97_vm6, %v223_v25, %v94_v44 }
  0x74   :  { %v55_v23 = vpop.permute.xlu1 %54  ;;  %v45_v24 = vpop.permute.xlu0 %44 }
  0x75   :  { %v62_v28 = vmul.f32 %v45_v24, %v34_v5  ;;  %v64_v32 = vmul.f32 %v55_v23, %v36_v9 }
  0x7c   :  { %v50_v27 = vpop.permute.xlu0 %49  ;;  %v60_v30 = vpop.permute.xlu1 %59 }
  0x7d   :  { %v63_v29 = vmul.f32 %v50_v27, %v35_v6  ;;  %v65_v35 = vmul.f32 %v60_v30, %v37_v12 }
  0x7f   :  { %v66_v33 = vadd.f32 %v63_v29, %v62_v28 }
  0x81   :  { %v67_v36 = vadd.f32 %v66_v33, %v64_v32 }
  0x83   :  { %v68_v38 = vadd.f32 %v67_v36, %v65_v35 }
  0x85   :  { %v69_v40 = vrot.slane %v68_v38, 4 }
  0x87   :  { %v70_v42 = vadd.f32 %v69_v40, %v68_v38 }
  0x89   :  { %v71_v43 = vrot.slane %v70_v42, 2 }
  0x8b   :  { %v72_v45 = vadd.f32 %v71_v43, %v70_v42 }
  0x8d   :  { %v73_v46 = vrot.slane %v72_v45, 1 }
  0x8f   :  { %v74_v49 = vadd.f32 %v73_v46, %v72_v45 }
  0x91   :  { %v99_v50 = vmul.f32 %v98_v48, %v74_v49 }
  0x93   :  { %v207_v51 = vadd.f32 -0.2, %v99_v50  ;;  %v114_v52 = vsub.f32 0.2, %v99_v50 }
  0x95   :  { %v115_v53 = vsel %vm112_vm10, %v207_v51, %v114_v52 }
  0x96   :  { %v116_v54 = vmax.f32 %v115_v53, 0.0 }
  0x98   :  { %v156_v55 = vsel %vm155_vm13, %v116_v54, 0.0  ;;  %v144_v56 = vsel %vm143_vm14, %v116_v54, 0.0  ;;  %v119_v57 = vsel %vm118_vm15, %v116_v54, 0.0  ;;  %v131_v61 = vsel %vm299_vm8, %v116_v54, 0.0 }
  0x99   :  { %v157_v58 = vsel %vm120_vm1, %v156_v55, 0.0  ;;  %v145_v59 = vsel %vm120_vm1, %v144_v56, 0.0  ;;  %v121_v60 = vsel %vm120_vm1, %v119_v57, 0.0  ;;  %v132_v62 = vsel %vm120_vm1, %v131_v61, 0.0 }
  0x9a   :  { %158 = vadd.xlane.f32.xlu1 %v157_v58  ;;  %146 = vadd.xlane.f32.xlu0 %v145_v59 }
  0x9b   :  { %122 = vadd.xlane.f32.xlu2 %v121_v60 }
  0xa3   :  { %133 = vadd.xlane.f32.xlu2 %v132_v62 }
 0x10d   :  { %v159_v63 = vpop.xlane.xlu1 %158  ;;  %v147_v0 = vpop.xlane.xlu0 %146 }
 0x10e   :  { %v148_v1 = vrot.slane %v147_v0, 4  ;;  %v123_v2 = vpop.xlane.xlu2 %122  ;;  %v160_v3 = vrot.slane %v159_v63, 4 }
 0x10f   :  { %v124_v4 = vrot.slane %v123_v2, 4 }
 0x110   :  { %v149_v6 = vadd.f32 %v148_v1, %v147_v0  ;;  %v161_v7 = vadd.f32 %v160_v3, %v159_v63 }
 0x111   :  { %v125_v5 = vadd.f32 %v124_v4, %v123_v2 }
 0x112   :  { %v150_v10 = vrot.slane %v149_v6, 2  ;;  %v162_v12 = vrot.slane %v161_v7, 2 }
 0x113   :  { %v126_v8 = vrot.slane %v125_v5, 2 }
 0x114   :  { %v151_v17 = vadd.f32 %v150_v10, %v149_v6  ;;  %v163_v18 = vadd.f32 %v162_v12, %v161_v7 }
 0x115   :  { %v127_v9 = vadd.f32 %v126_v8, %v125_v5 }
 0x116   :  { %v134_v11 = vpop.xlane.xlu2 %133  ;;  %v152_v21 = vrot.slane %v151_v17, 1  ;;  %v164_v23 = vrot.slane %v163_v18, 1 }
 0x117   :  { %v135_v13 = vrot.slane %v134_v11, 4  ;;  %v128_v14 = vrot.slane %v127_v9, 1 }
 0x118   :  { %v153_v25 = vadd.f32 %v152_v21, %v151_v17  ;;  %v165_v26 = vadd.f32 %v164_v23, %v163_v18 }
 0x119   :  { %v136_v15 = vadd.f32 %v135_v13, %v134_v11  ;;  %v129_v16 = vadd.f32 %v128_v14, %v127_v9 }
 0x11b   :  { %v137_v19 = vrot.slane %v136_v15, 2  ;;  %208 = vpush %v129_v16 }
 0x11d   :  { %v138_v20 = vadd.f32 %v137_v19, %v136_v15 }
 0x11f   :  { %v139_v22 = vrot.slane %v138_v20, 1 }
 0x121   :  { %v140_v24 = vadd.f32 %v139_v22, %v138_v20 }
 0x123   :  { %210 = vpush %v140_v24 }
 0x124   :  { %212 = vpush %v153_v25 }
 0x125   :  { %214 = vpush %v165_v26 }
 0x14c   :  { %s209_s1 = spop %208 }
 0x14d   :  { %v168_v27 = vstv %s209_s1 }
 0x14e   :  { %v169_v29 = vsel %vm167_vm0, %v168_v27, 0.0 }
 0x154   :  { %s211_s24 = spop %210 }
 0x155   :  { %v171_v28 = vstv %s211_s24  ;;  %s213_s25 = spop %212 }
 0x156   :  { %v172_v30 = vsel %vm170_vm2, %v171_v28, 0.0  ;;  %v175_v31 = vstv %s213_s25  ;;  %s215_s26 = spop %214 }
 0x157   :  { %v173_v32 = vadd.f32 %v172_v30, %v169_v29  ;;  %v179_v33 = vstv %s215_s26  ;;  %v176_v34 = vsel %vm174_vm3, %v175_v31, 0.0 }
 0x158   :  { %v180_v36 = vsel %vm178_vm4, %v179_v33, 0.0 }
 0x159   :  { %v177_v35 = vadd.f32 %v176_v34, %v173_v32 }
 0x15b   :  { %v181_v37 = vadd.f32 %v180_v36, %v177_v35 }
 0x15d   :  { %184 = vst [vmem:[#allocation2] sm:$0xff] %v181_v37 }
 0x15e   :  { %195 = dma.vmem_to_hbm [thread:$0]  %s191_s28, 128, %s193_s3, [#allocation3]  }
 0x15f   :  { %248 = dma.done.wait [#allocation3], 128  }
 0x160   :  { %249 = vsyncadd [#allocation3], 4294967168 }
 0x161   :  { %200 = vsyncpa [#allocation3], 1 }

</bundles_post_ra>
